<compile_context>
chip_gen: v5e
topology: v5e:2x2
jax: 0.10.0
libtpu: 0.0.40
codegen_flags: <defaults>
</compile_context>

<pallas_src>
import jax
import jax.numpy as jnp
from jax.experimental import pallas as pl
from jax.experimental.pallas import tpu as pltpu

_LANE = 128
_SUBLANE = 8
_GRAN = _SUBLANE * _LANE  # 1024 batch elements = one dense f32 (8,128) slab


def _linear_kernel(w_ref, b_ref, x_ref, o_ref):
    # w_ref: SMEM (2,) f32, b_ref: SMEM (1,) f32
    # x_ref: VMEM (2, TM, 128) f32   (features on leading axis, batch dense)
    # o_ref: VMEM (TM, 128) f32
    w0 = w_ref[0]
    w1 = w_ref[1]
    b = b_ref[0]
    # Pure VPU: two scalar-broadcast FMAs on fully packed (TM, 128) slabs.
    o_ref[...] = x_ref[0] * w0 + x_ref[1] * w1 + b


def simple_model3_forward(x, weight, bias, *, block_n=131072,
                          small_n_threshold=4096):
    """Pallas forward for SimpleModel3 (torch.nn.Linear(2, 1)).

    x:      (N, 2) float32
    weight: (1, 2) float32  (torch layout: out_features x in_features)
    bias:   (1,)   float32
    returns (N, 1) float32
    """
    n, in_f = x.shape
    out_f, w_in = weight.shape
    assert in_f == 2 and w_in == 2 and out_f == 1 and bias.shape == (1,), (
        "kernel is specialized to Linear(2, 1)")

    # Tiny batches: pure XLA fuses this into neighbors; skip kernel overhead.
    if n < small_n_threshold:
        return x @ weight.T + bias

    # Tile granule is one dense (8, 128) slab = 1024 batch elements.
    block_n = max(_GRAN, (block_n // _GRAN) * _GRAN)
    n_pad_min = pl.cdiv(n, _GRAN) * _GRAN
    tn = min(block_n, n_pad_min)
    # Ensure >= 2 grid steps when possible so v7x can shard across its 2 TCs.
    if n_pad_min > _GRAN and tn >= n_pad_min:
        tn = max(_GRAN, (n_pad_min // 2 // _GRAN) * _GRAN)
    n_pad = pl.cdiv(n, tn) * tn

    tm = tn // _LANE            # sublane rows per tile (multiple of 8)
    rows_pad = n_pad // _LANE

    # Single pad pass, then relayout batch densely over (rows, 128).
    x_p = jnp.pad(x, ((0, n_pad - n), (0, 0)))        # (n_pad, 2)
    x_t = x_p.T.reshape(in_f, rows_pad, _LANE)        # (2, rows_pad, 128)

    w_flat = weight.reshape(-1).astype(jnp.float32)   # (2,)  -> SMEM
    b_flat = bias.reshape(-1).astype(jnp.float32)     # (1,)  -> SMEM

    # VMEM budget: double-buffered in + out tiles, plus headroom.
    tile_bytes = (in_f * tm * _LANE + tm * _LANE) * 4
    vmem_limit = min(max(2 * tile_bytes + (4 << 20), 16 << 20), 100 << 20)

    y = pl.pallas_call(
        _linear_kernel,
        out_shape=jax.ShapeDtypeStruct((rows_pad, _LANE), x.dtype),
        grid=(rows_pad // tm,),
        in_specs=[
            pl.BlockSpec(memory_space=pltpu.MemorySpace.SMEM),   # weight (2,)
            pl.BlockSpec(memory_space=pltpu.MemorySpace.SMEM),   # bias   (1,)
            pl.BlockSpec((in_f, tm, _LANE), lambda i: (0, i, 0)),  # x tile
        ],
        out_specs=pl.BlockSpec((tm, _LANE), lambda i: (i, 0)),     # y tile
        compiler_params=pltpu.CompilerParams(
            dimension_semantics=("parallel",),
            vmem_limit_bytes=vmem_limit,
        ),
    )(w_flat, b_flat, x_t)

    # Back to torch layout (N, 1); drop padding.
    return y.reshape(n_pad)[:n].reshape(n, 1)


if __name__ == "__main__":
    key = jax.random.PRNGKey(0)
    kx, kw, kb, kx2 = jax.random.split(key, 4)

    IN_F, OUT_F = 2, 1
    bound = 1.0 / (IN_F ** 0.5)
    weight = jax.random.uniform(kw, (OUT_F, IN_F), minval=-bound, maxval=bound,
                                dtype=jnp.float32)
    bias = jax.random.uniform(kb, (OUT_F,), minval=-bound, maxval=bound,
                              dtype=jnp.float32)

    # Case 1: module's native tiny batch (N=8) -> fused XLA fallback path.
    N = 8
    x = jax.random.normal(kx, (N, IN_F), dtype=jnp.float32)
    y = simple_model3_forward(x, weight, bias)
    jax.block_until_ready(y)
    y_ref = x @ weight.T + bias
    assert y.shape == (N, OUT_F)
    assert jnp.allclose(y, y_ref, atol=1e-5, rtol=1e-5)

    # Case 2: same tiny batch, Pallas path forced (exercises the kernel).
    y_k = simple_model3_forward(x, weight, bias, small_n_threshold=0)
    jax.block_until_ready(y_k)
    assert y_k.shape == (N, OUT_F)
    assert jnp.allclose(y_k, y_ref, atol=1e-5, rtol=1e-5)

    # Case 3: batch large enough for a multi-step grid on the Pallas path.
    N2 = 4096
    x2 = jax.random.normal(kx2, (N2, IN_F), dtype=jnp.float32)
    y2 = simple_model3_forward(x2, weight, bias)
    jax.block_until_ready(y2)
    y2_ref = x2 @ weight.T + bias
    assert y2.shape == (N2, OUT_F)
    assert jnp.allclose(y2, y2_ref, atol=1e-5, rtol=1e-5)

    print("KERNEL_OK")
</pallas_src>

<mosaic_0001>
module attributes {stable_mosaic.version = 11 : i64} {
  func.func @_linear_kernel(%arg0: i32, %arg1: memref<2xf32, #tpu.memory_space<smem>>, %arg2: memref<1xf32, #tpu.memory_space<smem>>, %arg3: memref<2x8x128xf32, #tpu.memory_space<vmem>>, %arg4: memref<8x128xf32, #tpu.memory_space<vmem>>) attributes {dimension_semantics = [#tpu.dimension_semantics<parallel>], iteration_bounds = array<i64: 1>, scalar_prefetch = 0 : i64, scratch_operands = 0 : i64, tpu.core_type = #tpu.core_type<tc>, window_params = [{transform_indices = @transform_0, window_bounds = array<i64: 2>}, {transform_indices = @transform_1, window_bounds = array<i64: 1>}, {transform_indices = @transform_2, window_bounds = array<i64: 2, 8, 128>}, {transform_indices = @transform_3, window_bounds = array<i64: 8, 128>}]} {
    %c0 = arith.constant 0 : index
    %0 = memref.load %arg1[%c0] : memref<2xf32, #tpu.memory_space<smem>>
    %c1 = arith.constant 1 : index
    %1 = memref.load %arg1[%c1] : memref<2xf32, #tpu.memory_space<smem>>
    %c0_0 = arith.constant 0 : index
    %2 = memref.load %arg2[%c0_0] : memref<1xf32, #tpu.memory_space<smem>>
    %c0_1 = arith.constant 0 : index
    %c0_2 = arith.constant 0 : index
    %c0_3 = arith.constant 0 : index
    %3 = vector.load %arg3[%c0_1, %c0_2, %c0_3] : memref<2x8x128xf32, #tpu.memory_space<vmem>>, vector<1x8x128xf32>
    %4 = vector.shape_cast %3 : vector<1x8x128xf32> to vector<8x128xf32>
    %5 = vector.broadcast %0 : f32 to vector<8x128xf32>
    %6 = arith.mulf %4, %5 : vector<8x128xf32>
    %c1_4 = arith.constant 1 : index
    %c0_5 = arith.constant 0 : index
    %c0_6 = arith.constant 0 : index
    %7 = vector.load %arg3[%c1_4, %c0_5, %c0_6] : memref<2x8x128xf32, #tpu.memory_space<vmem>>, vector<1x8x128xf32>
    %8 = vector.shape_cast %7 : vector<1x8x128xf32> to vector<8x128xf32>
    %9 = vector.broadcast %1 : f32 to vector<8x128xf32>
    %10 = arith.mulf %8, %9 : vector<8x128xf32>
    %11 = arith.addf %6, %10 : vector<8x128xf32>
    %12 = vector.broadcast %2 : f32 to vector<8x128xf32>
    %13 = arith.addf %11, %12 : vector<8x128xf32>
    %c0_7 = arith.constant 0 : index
    %c0_8 = arith.constant 0 : index
    %14 = vector.load %arg4[%c0_7, %c0_8] : memref<8x128xf32, #tpu.memory_space<vmem>>, vector<8x128xf32>
    tpu.vector_store %arg4[%c0_7, %c0_8], %13 {strides = array<i32>} : memref<8x128xf32, #tpu.memory_space<vmem>>, vector<8x128xf32>,
    return
  }
  func.func @transform_0(%arg0: i32) -> i32 {
    %c0_i32 = arith.constant 0 : i32
    %c0_i32_0 = arith.constant 0 : i32
    return %c0_i32 : i32
  }
  func.func @transform_1(%arg0: i32) -> i32 {
    %c0_i32 = arith.constant 0 : i32
    %c0_i32_0 = arith.constant 0 : i32
    return %c0_i32 : i32
  }
  func.func @transform_2(%arg0: i32) -> (i32, i32, i32) {
    %c0_i32 = arith.constant 0 : i32
    %c0_i32_0 = arith.constant 0 : i32
    %c0_i32_1 = arith.constant 0 : i32
    return %c0_i32, %arg0, %c0_i32_0 : i32, i32, i32
  }
  func.func @transform_3(%arg0: i32) -> (i32, i32) {
    %c0_i32 = arith.constant 0 : i32
    %c0_i32_0 = arith.constant 0 : i32
    return %arg0, %c0_i32 : i32, i32
  }
}

</mosaic_0001>

<bundles_post_ra>
// kernel: tpu_custom_call.1
= control target key start
LH: loop header
LB: loop body
LE: loop exit
PB: predicated region body
PF: predicated region fallthrough
CT: control target
= control target key end

     0   :  { %9 = vsyncpa [#allocation6], 0  ;;  %s186_s0 = inlined_call_operand.vmem [shape: f32[2], index: 0, kind: input, shape index: {}]   ;;  %s187_s1 = inlined_call_operand.<no memory space> [shape: f32[1], index: 1, kind: input, shape index: {}]   ;;  %s188_s2 = inlined_call_operand.hbm [shape: f32[2,8,128], index: 2, kind: input, shape index: {}]   ;;  %s189_s3 = inlined_call_operand.hbm [shape: f32[8,128], index: 3, kind: output, shape index: {}]  }
   0x1   :  { %10 = vsyncpa [#allocation4], 0 }
   0x2   :  { %11 = vsyncpa [#allocation5], 0  ;;  %s17_s14 = sshll.u32 %s186_s0, 4  ;;  %s27_s17 = sshll.u32 %s188_s2, 4  ;;  %s18_s14 = int_to_ptr.vmem [resolvable:$true] %s17_s14  ;;  %s28_s17 = int_to_ptr.hbm [resolvable:$true] %s27_s17 }
   0x3   :  { %s149_s18 = smov [#allocation3]   ;;  %s150_s19 = smov [#allocation7]  }
   0x4   :  { %20 = dma.vmem_to_smem %s18_s14, 16, %s149_s18, [#allocation6]  }
   0x5   :  { %s29_s20 = sshll.u32 %s150_s19, 4  ;;  %s151_s21 = smov 128   ;;  %s30_s20 = int_to_ptr.vmem [resolvable:$true] %s29_s20 }
   0x6   :  { %s152_s22 = smov 8  }
   0x7   :  { %35 = dma.hbm_to_vmem [thread:$0]  %s28_s17, 256, %s30_s20, [#allocation4], %s151_s21, %s151_s21, %s152_s22  }
   0x8   :  { %143 = dma.done.wait [#allocation6], 16  }
   0x9   :  { %144 = vsyncadd [#allocation6], 4294967280 }
   0xa   :  { %145 = dma.done.wait [#allocation4], 256  }
   0xb   :  { %146 = vsyncadd [#allocation4], 4294967040 }
   0xc   :  { %44 = sfence }
   0xd   :  { %s45_s0 = sld [smem:[#allocation3]]  ;;  %v48_v0 = vld [vmem:[#allocation7] sm:$0xff]  ;;  %v52_v1 = vld [vmem:[#allocation7 + $0x8] sm:$0xff]  ;;  %v56_v6 = vstv %s187_s1  ;;  %s153_s25 = smov [#allocation8]  }
   0xe   :  { %s77_s23 = sld [smem:[#allocation3 + $0x1]]  ;;  %s64_s26 = sshll.u32 %s153_s25, 4  ;;  %s65_s26 = int_to_ptr.vmem [resolvable:$true] %s64_s26 }
   0xf   :  { %s66_s29 = sshll.u32 %s189_s3, 4  ;;  %s67_s29 = int_to_ptr.hbm [resolvable:$true] %s66_s29 }
  0x13   :  { %v49_v2 = vstv %s45_s0 }
  0x14   :  { %v50_v3 = vmul.f32 %v49_v2, %v48_v0  ;;  %v53_v4 = vstv %s77_s23 }
  0x15   :  { %v54_v5 = vmul.f32 %v53_v4, %v52_v1 }
  0x17   :  { %v55_v7 = vadd.f32 %v54_v5, %v50_v3 }
  0x19   :  { %v57_v8 = vadd.f32 %v56_v6, %v55_v7 }
  0x1b   :  { %58 = vst [vmem:[#allocation8] sm:$0xff] %v57_v8 }
  0x1c   :  { %69 = dma.vmem_to_hbm [thread:$0]  %s65_s26, 128, %s67_s29, [#allocation5]  }
  0x1d   :  { %147 = dma.done.wait [#allocation5], 128  }
  0x1e   :  { %148 = vsyncadd [#allocation5], 4294967168 }
  0x1f   :  { %74 = vsyncpa [#allocation4], 1 }
  0x20   :  { %75 = vsyncpa [#allocation5], 1 }
  0x21   :  { %76 = vsyncpa [#allocation6], 1 }

</bundles_post_ra>
